<compile_context>
chip_gen: v7x
topology: tpu7x:2x2x1
jax: 0.10.0
libtpu: 0.0.40
codegen_flags: <defaults>
</compile_context>

<pallas_src>
import math

import jax
import jax.numpy as jnp
from jax.experimental import pallas as pl
from jax.experimental.pallas import tpu as pltpu


# ----------------------------- configuration ------------------------------
B = 16                     # demo batch size (fills one packed bf16 LHS tile)
INPUT_LEN = 24             # x_tir feature length
DEVICE_FEATURE_LEN = 16    # x_device feature length
INPUT_LAYER_UNIT = 32
EMBEDDED_LAYERS = [32, 32]
EMBED_FEATURE_LEN = 32
REGRESSION_LAYERS = [32, 32]
DEVICE_HIDDEN = [128, 128, 128]
BN_EPS = 1e-5

SLAB = 128                 # padded feature width (lanes) of every layer block
PRED_COL = EMBED_FEATURE_LEN   # lane where preds land in the output slab


def _use_fused_branches() -> bool:
    """256-wide block-diagonal branch fusion only pays on 256-wide MXUs
    (v6e / v7x).  Keep 128-wide per-branch matmuls on v5e and older."""
    try:
        kind = jax.devices()[0].device_kind.lower()
    except Exception:  # pragma: no cover - conservative default
        return True
    return not any(tag in kind for tag in ("v2", "v3", "v4", "v5"))


FUSED = _use_fused_branches()


# --------------------------- in-kernel helpers ------------------------------
def _linear(v, w_ref, b_ref, i, relu):
    # bf16 x bf16 on the MXU, f32 accumulation; bias add + ReLU in f32.
    y = jnp.dot(v.astype(jnp.bfloat16), w_ref[i],
                preferred_element_type=jnp.float32) + b_ref[i]
    return jnp.maximum(y, 0.0) if relu else y


def _batchnorm(v):
    # BatchNorm1d(affine=False), training-mode biased batch statistics.
    mean = jnp.mean(v, axis=0, keepdims=True)
    var = jnp.mean((v - mean) ** 2, axis=0, keepdims=True)
    return (v - mean) * jax.lax.rsqrt(var + BN_EPS)


# ------------------------------ Pallas kernels ------------------------------
def matchnet_kernel_fused(x_tir_ref, x_dev_ref, w2_ref, b2_ref, w1_ref, b1_ref,
                          out_ref, xbuf):
    """v6e / v7x variant.

    x_tir_ref [B,24] f32, x_dev_ref [B,16] f32,
    w2_ref [3,256,256] bf16 block-diag(emb_i, dev_i), b2_ref [3,1,256] f32,
    w1_ref [4,128,128] bf16 (dev3, reg0, reg1, out@lane32), b1_ref [4,1,128] f32,
    out_ref [B,128] f32 (lanes 0:32 = embedding, lane 32 = preds),
    xbuf [B,256] f32 VMEM scratch (input slab assembled in-kernel)."""
    # Assemble the lane-dense input slab inside the kernel (no wrapper fusion,
    # no HBM round-trip of the slab).
    xbuf[...] = jnp.zeros_like(xbuf)
    xbuf[:, :INPUT_LEN] = x_tir_ref[...]                              # emb half
    xbuf[:, SLAB:SLAB + DEVICE_FEATURE_LEN] = x_dev_ref[...]          # dev half

    # Three fused block-diagonal stages advance both branches together.
    x = xbuf[...]
    for i in range(3):
        x = _linear(x, w2_ref, b2_ref, i, True)

    h = x[:, :SLAB]                                   # embedding branch (done)
    d = _linear(x[:, SLAB:], w1_ref, b1_ref, 0, True)  # DeviceEmbed last layer

    # is_cross_device == 'add'
    emb = _batchnorm(h) + _batchnorm(d)

    # Regression MLP -> OutputLayer (output weight routed to lane PRED_COL).
    r = emb
    for i in (1, 2):
        r = _linear(r, w1_ref, b1_ref, i, True)
    preds_full = _linear(r, w1_ref, b1_ref, 3, False)

    # Single lane-dense store: emb occupies lanes 0:32 (zero elsewhere),
    # preds_full is nonzero only at lane PRED_COL=32.
    out_ref[...] = emb + preds_full


def matchnet_kernel_split(x_tir_ref, x_dev_ref, we_ref, be_ref, wd_ref, bd_ref,
                          wt_ref, bt_ref, out_ref, ebuf, dbuf):
    """v5e variant: 128-wide blocks, one layer per matmul (native 128x128 MXU)."""
    ebuf[...] = jnp.zeros_like(ebuf)
    ebuf[:, :INPUT_LEN] = x_tir_ref[...]
    dbuf[...] = jnp.zeros_like(dbuf)
    dbuf[:, :DEVICE_FEATURE_LEN] = x_dev_ref[...]

    h = ebuf[...]
    for i in range(3):                      # folded-emb0, emb1, emb2
        h = _linear(h, we_ref, be_ref, i, True)

    d = dbuf[...]
    for i in range(4):                      # dev0..dev3
        d = _linear(d, wd_ref, bd_ref, i, True)

    emb = _batchnorm(h) + _batchnorm(d)

    r = emb
    for i in (0, 1):                        # reg0, reg1
        r = _linear(r, wt_ref, bt_ref, i, True)
    preds_full = _linear(r, wt_ref, bt_ref, 2, False)   # out @ lane PRED_COL

    out_ref[...] = emb + preds_full


# ------------------------------ JAX wrapper --------------------------------
@jax.jit
def matchnet_forward(x_tir, x_device, *packed):
    b = x_tir.shape[0]
    vmem = pl.BlockSpec(memory_space=pltpu.MemorySpace.VMEM)

    if FUSED:
        kernel = matchnet_kernel_fused
        scratch = [pltpu.VMEM((b, 2 * SLAB), jnp.float32)]
        flops = 2 * b * (3 * (2 * SLAB) * (2 * SLAB) + 4 * SLAB * SLAB)
    else:
        kernel = matchnet_kernel_split
        scratch = [pltpu.VMEM((b, SLAB), jnp.float32),
                   pltpu.VMEM((b, SLAB), jnp.float32)]
        flops = 2 * b * 10 * SLAB * SLAB

    bytes_accessed = (sum(int(a.size) * a.dtype.itemsize
                          for a in (x_tir, x_device) + packed)
                      + b * SLAB * 4)

    out = pl.pallas_call(
        kernel,
        out_shape=jax.ShapeDtypeStruct((b, SLAB), jnp.float32),
        in_specs=[vmem] * (2 + len(packed)),
        out_specs=vmem,
        scratch_shapes=scratch,
        cost_estimate=pl.CostEstimate(flops=flops,
                                      transcendentals=2 * SLAB,
                                      bytes_accessed=bytes_accessed),
    )(x_tir, x_device, *packed)

    embedding = out[:, :EMBED_FEATURE_LEN]
    preds = out[:, PRED_COL:PRED_COL + 1]
    return preds, embedding


# --------------------------- parameter creation ----------------------------
def init_linear(key, fan_in, fan_out):
    kw, kb = jax.random.split(key)
    bound = 1.0 / math.sqrt(fan_in)
    w = jax.random.uniform(kw, (fan_in, fan_out), jnp.float32, -bound, bound)
    b = jax.random.uniform(kb, (1, fan_out), jnp.float32, -bound, bound)
    return w, b


def build_params(key):
    """Per-layer (W, b) in PyTorch nn.Linear ([in, out]) convention."""
    layer_dims = [(INPUT_LEN, INPUT_LAYER_UNIT)]                        # InputLayer
    emb = [INPUT_LAYER_UNIT] + EMBEDDED_LAYERS + [EMBED_FEATURE_LEN]
    layer_dims += list(zip(emb[:-1], emb[1:]))                          # Embedding
    dev = [DEVICE_FEATURE_LEN] + DEVICE_HIDDEN + [EMBED_FEATURE_LEN]
    layer_dims += list(zip(dev[:-1], dev[1:]))                          # DeviceEmbed
    reg = [EMBED_FEATURE_LEN] + REGRESSION_LAYERS
    layer_dims += list(zip(reg[:-1], reg[1:]))                          # Regression
    layer_dims.append((REGRESSION_LAYERS[-1], 1))                       # OutputLayer
    keys = jax.random.split(key, len(layer_dims))
    return [init_linear(k, fi, fo) for k, (fi, fo) in zip(keys, layer_dims)]


def _fold_input_layer(params):
    """Fold the activation-free InputLayer into the first Embedding layer
    (exact algebra) and split layers into (emb, dev, tail) groups."""
    (w_in, b_in), (w_e0, b_e0) = params[0], params[1]
    w_fold = w_in @ w_e0                       # [24, 32]
    b_fold = b_in @ w_e0 + b_e0                # [1, 32]
    emb = [(w_fold, b_fold), params[2], params[3]]         # 3 layers, ReLU
    dev = list(params[4:8])                                 # 4 layers, ReLU
    tail = list(params[8:11])                               # reg0, reg1, out
    return emb, dev, tail


def pack_params_fused(params):
    """Block-diagonal 256-wide packing for v6e/v7x (host side, done once)."""
    emb, dev, tail = _fold_input_layer(params)
    w2 = jnp.zeros((3, 2 * SLAB, 2 * SLAB), jnp.float32)
    b2 = jnp.zeros((3, 1, 2 * SLAB), jnp.float32)
    for i in range(3):
        (we, be), (wd, bd) = emb[i], dev[i]
        w2 = w2.at[i, :we.shape[0], :we.shape[1]].set(we)
        b2 = b2.at[i, 0, :we.shape[1]].set(be.reshape(-1))
        w2 = w2.at[i, SLAB:SLAB + wd.shape[0], SLAB:SLAB + wd.shape[1]].set(wd)
        b2 = b2.at[i, 0, SLAB:SLAB + wd.shape[1]].set(bd.reshape(-1))

    singles = [dev[3], tail[0], tail[1], tail[2]]   # dev3, reg0, reg1, out
    col_off = [0, 0, 0, PRED_COL]                   # route preds to lane 32
    w1 = jnp.zeros((4, SLAB, SLAB), jnp.float32)
    b1 = jnp.zeros((4, 1, SLAB), jnp.float32)
    for i, ((w, bias), co) in enumerate(zip(singles, col_off)):
        w1 = w1.at[i, :w.shape[0], co:co + w.shape[1]].set(w)
        b1 = b1.at[i, 0, co:co + w.shape[1]].set(bias.reshape(-1))
    return (w2.astype(jnp.bfloat16), b2, w1.astype(jnp.bfloat16), b1)


def pack_params_split(params):
    """128-wide per-branch packing for v5e (host side, done once)."""
    emb, dev, tail = _fold_input_layer(params)

    def pack(layers, col_off=None):
        n = len(layers)
        co = col_off or [0] * n
        w = jnp.zeros((n, SLAB, SLAB), jnp.float32)
        b = jnp.zeros((n, 1, SLAB), jnp.float32)
        for i, ((wi, bi), c) in enumerate(zip(layers, co)):
            w = w.at[i, :wi.shape[0], c:c + wi.shape[1]].set(wi)
            b = b.at[i, 0, c:c + wi.shape[1]].set(bi.reshape(-1))
        return w.astype(jnp.bfloat16), b

    we, be = pack(emb)
    wd, bd = pack(dev)
    wt, bt = pack(tail, col_off=[0, 0, PRED_COL])
    return (we, be, wd, bd, wt, bt)


def pack_params(params):
    return pack_params_fused(params) if FUSED else pack_params_split(params)


# ----------------------- pure-JAX reference (same recipe) -------------------
def matchnet_reference(x_tir, x_device, params):
    emb, dev, tail = _fold_input_layer(params)

    def run(x, layers, relu_flags):
        for (w, bias), relu in zip(layers, relu_flags):
            x = jnp.dot(x.astype(jnp.bfloat16), w.astype(jnp.bfloat16),
                        preferred_element_type=jnp.float32) + bias
            if relu:
                x = jnp.maximum(x, 0.0)
        return x

    def bn(v):
        mean = jnp.mean(v, axis=0, keepdims=True)
        var = jnp.mean((v - mean) ** 2, axis=0, keepdims=True)
        return (v - mean) * jax.lax.rsqrt(var + BN_EPS)

    h = run(x_tir, emb, [True] * 3)
    d = run(x_device, dev, [True] * 4)
    e = bn(h) + bn(d)
    r = run(e, tail[:2], [True, True])
    preds = run(r, tail[2:], [False])
    return preds, e


# --------------------------------- main -------------------------------------
if __name__ == "__main__":
    root = jax.random.PRNGKey(0)
    k_tir, k_dev, k_par = jax.random.split(root, 3)

    x_tir = jax.random.normal(k_tir, (B, INPUT_LEN), jnp.float32)
    x_device = jax.random.normal(k_dev, (B, DEVICE_FEATURE_LEN), jnp.float32)
    params = build_params(k_par)
    packed = pack_params(params)

    preds, embedding = matchnet_forward(x_tir, x_device, *packed)
    jax.block_until_ready((preds, embedding))

    assert preds.shape == (B, 1)
    assert embedding.shape == (B, EMBED_FEATURE_LEN)

    # Tolerance check against a pure-JAX mirror of the same (bf16-weight)
    # recipe — bf16 storage means it cannot bit-match an f32 reference.
    ref_preds, ref_emb = matchnet_reference(x_tir, x_device, params)
    assert bool(jnp.allclose(preds, ref_preds, rtol=2e-2, atol=2e-2))
    assert bool(jnp.allclose(embedding, ref_emb, rtol=2e-2, atol=2e-2))

    # Host-side mirror of the PyTorch TrainInfinityError NaN/Inf check.
    if not bool(jnp.all(jnp.isfinite(preds))):
        raise FloatingPointError("Found NaN/Inf in preds")

    # TODO(synk): Discriminator / EuclidianDistance are defined but unused in
    # MyMatchNet.forward(), so they are intentionally not implemented here.
    print("KERNEL_OK")
</pallas_src>

<mosaic_0001>
module attributes {stable_mosaic.version = 11 : i64} {
  func.func @matchnet_kernel_fused(%arg0: memref<16x24xf32, #tpu.memory_space<vmem>>, %arg1: memref<16x16xf32, #tpu.memory_space<vmem>>, %arg2: memref<3x256x256xbf16, #tpu.memory_space<vmem>>, %arg3: memref<3x1x256xf32, #tpu.memory_space<vmem>>, %arg4: memref<4x128x128xbf16, #tpu.memory_space<vmem>>, %arg5: memref<4x1x128xf32, #tpu.memory_space<vmem>>, %arg6: memref<16x128xf32, #tpu.memory_space<vmem>>, %arg7: memref<16x256xf32, #tpu.memory_space<vmem>>) attributes {dimension_semantics = [], scalar_prefetch = 0 : i64, scratch_operands = 1 : i64, tpu.core_type = #tpu.core_type<tc>} {
    %cst = arith.constant 0.000000e+00 : f32
    %0 = vector.broadcast %cst : f32 to vector<16x256xf32>
    %c0 = arith.constant 0 : index
    %c0_0 = arith.constant 0 : index
    %1 = vector.load %arg7[%c0, %c0_0] : memref<16x256xf32, #tpu.memory_space<vmem>>, vector<16x256xf32>
    tpu.vector_store %arg7[%c0, %c0_0], %0 {strides = array<i32>} : memref<16x256xf32, #tpu.memory_space<vmem>>, vector<16x256xf32>,
    %c0_1 = arith.constant 0 : index
    %c0_2 = arith.constant 0 : index
    %2 = vector.load %arg0[%c0_1, %c0_2] : memref<16x24xf32, #tpu.memory_space<vmem>>, vector<16x24xf32>
    %c0_3 = arith.constant 0 : index
    %c0_4 = arith.constant 0 : index
    %3 = vector.load %arg7[%c0_3, %c0_4] : memref<16x256xf32, #tpu.memory_space<vmem>>, vector<16x24xf32>
    tpu.vector_store %arg7[%c0_3, %c0_4], %2 {strides = array<i32>} : memref<16x256xf32, #tpu.memory_space<vmem>>, vector<16x24xf32>,
    %c0_5 = arith.constant 0 : index
    %c0_6 = arith.constant 0 : index
    %4 = vector.load %arg1[%c0_5, %c0_6] : memref<16x16xf32, #tpu.memory_space<vmem>>, vector<16x16xf32>
    %c0_7 = arith.constant 0 : index
    %c128 = arith.constant 128 : index
    %5 = vector.load %arg7[%c0_7, %c128] : memref<16x256xf32, #tpu.memory_space<vmem>>, vector<16x16xf32>
    tpu.vector_store %arg7[%c0_7, %c128], %4 {strides = array<i32>} : memref<16x256xf32, #tpu.memory_space<vmem>>, vector<16x16xf32>,
    %c0_8 = arith.constant 0 : index
    %c0_9 = arith.constant 0 : index
    %6 = vector.load %arg7[%c0_8, %c0_9] : memref<16x256xf32, #tpu.memory_space<vmem>>, vector<16x256xf32>
    %7 = arith.truncf %6 : vector<16x256xf32> to vector<16x256xbf16>
    %c0_10 = arith.constant 0 : index
    %c0_11 = arith.constant 0 : index
    %c0_12 = arith.constant 0 : index
    %8 = vector.load %arg2[%c0_10, %c0_11, %c0_12] : memref<3x256x256xbf16, #tpu.memory_space<vmem>>, vector<1x256x256xbf16>
    %9 = vector.shape_cast %8 : vector<1x256x256xbf16> to vector<256x256xbf16>
    %cst_13 = arith.constant dense<0.000000e+00> : vector<16x256xf32>
    %10 = tpu.matmul %7, %9, %cst_13 {dimension_numbers = #tpu.dot_dimension_numbers<[1], [0], [0], [1], [0, 0, 1, 1], [], []>} : vector<16x256xbf16>, vector<256x256xbf16>, vector<16x256xf32> -> vector<16x256xf32>
    %c0_14 = arith.constant 0 : index
    %c0_15 = arith.constant 0 : index
    %c0_16 = arith.constant 0 : index
    %11 = vector.load %arg3[%c0_14, %c0_15, %c0_16] : memref<3x1x256xf32, #tpu.memory_space<vmem>>, vector<1x1x256xf32>
    %12 = vector.shape_cast %11 : vector<1x1x256xf32> to vector<1x256xf32>
    %13 = vector.broadcast %12 : vector<1x256xf32> to vector<16x256xf32>
    %14 = arith.addf %10, %13 : vector<16x256xf32>
    %cst_17 = arith.constant 0.000000e+00 : f32
    %15 = vector.broadcast %cst_17 : f32 to vector<16x256xf32>
    %16 = arith.maximumf %14, %15 : vector<16x256xf32>
    %17 = arith.truncf %16 : vector<16x256xf32> to vector<16x256xbf16>
    %c1 = arith.constant 1 : index
    %c0_18 = arith.constant 0 : index
    %c0_19 = arith.constant 0 : index
    %18 = vector.load %arg2[%c1, %c0_18, %c0_19] : memref<3x256x256xbf16, #tpu.memory_space<vmem>>, vector<1x256x256xbf16>
    %19 = vector.shape_cast %18 : vector<1x256x256xbf16> to vector<256x256xbf16>
    %cst_20 = arith.constant dense<0.000000e+00> : vector<16x256xf32>
    %20 = tpu.matmul %17, %19, %cst_20 {dimension_numbers = #tpu.dot_dimension_numbers<[1], [0], [0], [1], [0, 0, 1, 1], [], []>} : vector<16x256xbf16>, vector<256x256xbf16>, vector<16x256xf32> -> vector<16x256xf32>
    %c1_21 = arith.constant 1 : index
    %c0_22 = arith.constant 0 : index
    %c0_23 = arith.constant 0 : index
    %21 = vector.load %arg3[%c1_21, %c0_22, %c0_23] : memref<3x1x256xf32, #tpu.memory_space<vmem>>, vector<1x1x256xf32>
    %22 = vector.shape_cast %21 : vector<1x1x256xf32> to vector<1x256xf32>
    %23 = vector.broadcast %22 : vector<1x256xf32> to vector<16x256xf32>
    %24 = arith.addf %20, %23 : vector<16x256xf32>
    %cst_24 = arith.constant 0.000000e+00 : f32
    %25 = vector.broadcast %cst_24 : f32 to vector<16x256xf32>
    %26 = arith.maximumf %24, %25 : vector<16x256xf32>
    %27 = arith.truncf %26 : vector<16x256xf32> to vector<16x256xbf16>
    %c2 = arith.constant 2 : index
    %c0_25 = arith.constant 0 : index
    %c0_26 = arith.constant 0 : index
    %28 = vector.load %arg2[%c2, %c0_25, %c0_26] : memref<3x256x256xbf16, #tpu.memory_space<vmem>>, vector<1x256x256xbf16>
    %29 = vector.shape_cast %28 : vector<1x256x256xbf16> to vector<256x256xbf16>
    %cst_27 = arith.constant dense<0.000000e+00> : vector<16x256xf32>
    %30 = tpu.matmul %27, %29, %cst_27 {dimension_numbers = #tpu.dot_dimension_numbers<[1], [0], [0], [1], [0, 0, 1, 1], [], []>} : vector<16x256xbf16>, vector<256x256xbf16>, vector<16x256xf32> -> vector<16x256xf32>
    %c2_28 = arith.constant 2 : index
    %c0_29 = arith.constant 0 : index
    %c0_30 = arith.constant 0 : index
    %31 = vector.load %arg3[%c2_28, %c0_29, %c0_30] : memref<3x1x256xf32, #tpu.memory_space<vmem>>, vector<1x1x256xf32>
    %32 = vector.shape_cast %31 : vector<1x1x256xf32> to vector<1x256xf32>
    %33 = vector.broadcast %32 : vector<1x256xf32> to vector<16x256xf32>
    %34 = arith.addf %30, %33 : vector<16x256xf32>
    %cst_31 = arith.constant 0.000000e+00 : f32
    %35 = vector.broadcast %cst_31 : f32 to vector<16x256xf32>
    %36 = arith.maximumf %34, %35 : vector<16x256xf32>
    %37 = vector.extract_strided_slice %36 {offsets = [0, 0], sizes = [16, 128], strides = [1, 1]} : vector<16x256xf32> to vector<16x128xf32>
    %38 = vector.extract_strided_slice %36 {offsets = [0, 128], sizes = [16, 128], strides = [1, 1]} : vector<16x256xf32> to vector<16x128xf32>
    %39 = arith.truncf %38 : vector<16x128xf32> to vector<16x128xbf16>
    %c0_32 = arith.constant 0 : index
    %c0_33 = arith.constant 0 : index
    %c0_34 = arith.constant 0 : index
    %40 = vector.load %arg4[%c0_32, %c0_33, %c0_34] : memref<4x128x128xbf16, #tpu.memory_space<vmem>>, vector<1x128x128xbf16>
    %41 = vector.shape_cast %40 : vector<1x128x128xbf16> to vector<128x128xbf16>
    %cst_35 = arith.constant dense<0.000000e+00> : vector<16x128xf32>
    %42 = tpu.matmul %39, %41, %cst_35 {dimension_numbers = #tpu.dot_dimension_numbers<[1], [0], [0], [1], [0, 0, 1, 1], [], []>} : vector<16x128xbf16>, vector<128x128xbf16>, vector<16x128xf32> -> vector<16x128xf32>
    %c0_36 = arith.constant 0 : index
    %c0_37 = arith.constant 0 : index
    %c0_38 = arith.constant 0 : index
    %43 = vector.load %arg5[%c0_36, %c0_37, %c0_38] : memref<4x1x128xf32, #tpu.memory_space<vmem>>, vector<1x1x128xf32>
    %44 = vector.shape_cast %43 : vector<1x1x128xf32> to vector<1x128xf32>
    %45 = vector.broadcast %44 : vector<1x128xf32> to vector<16x128xf32>
    %46 = arith.addf %42, %45 : vector<16x128xf32>
    %cst_39 = arith.constant 0.000000e+00 : f32
    %47 = vector.broadcast %cst_39 : f32 to vector<16x128xf32>
    %48 = arith.maximumf %46, %47 : vector<16x128xf32>
    %cst_40 = arith.constant dense<0.000000e+00> : vector<128xf32>
    %49 = vector.multi_reduction <add>, %37, %cst_40 [0] : vector<16x128xf32> to vector<128xf32>
    %50 = vector.shape_cast %49 : vector<128xf32> to vector<1x128xf32>
    %cst_41 = arith.constant 1.600000e+01 : f32
    %51 = vector.broadcast %cst_41 : f32 to vector<1x128xf32>
    %52 = arith.divf %50, %51 : vector<1x128xf32>
    %53 = vector.broadcast %52 : vector<1x128xf32> to vector<16x128xf32>
    %54 = arith.subf %37, %53 : vector<16x128xf32>
    %55 = arith.mulf %54, %54 : vector<16x128xf32>
    %cst_42 = arith.constant dense<0.000000e+00> : vector<128xf32>
    %56 = vector.multi_reduction <add>, %55, %cst_42 [0] : vector<16x128xf32> to vector<128xf32>
    %57 = vector.shape_cast %56 : vector<128xf32> to vector<1x128xf32>
    %cst_43 = arith.constant 1.600000e+01 : f32
    %58 = vector.broadcast %cst_43 : f32 to vector<1x128xf32>
    %59 = arith.divf %57, %58 : vector<1x128xf32>
    %60 = vector.broadcast %52 : vector<1x128xf32> to vector<16x128xf32>
    %61 = arith.subf %37, %60 : vector<16x128xf32>
    %cst_44 = arith.constant 9.99999974E-6 : f32
    %62 = vector.broadcast %cst_44 : f32 to vector<1x128xf32>
    %63 = arith.addf %59, %62 : vector<1x128xf32>
    %64 = math.rsqrt %63 : vector<1x128xf32>
    %65 = vector.broadcast %64 : vector<1x128xf32> to vector<16x128xf32>
    %66 = arith.mulf %61, %65 : vector<16x128xf32>
    %cst_45 = arith.constant dense<0.000000e+00> : vector<128xf32>
    %67 = vector.multi_reduction <add>, %48, %cst_45 [0] : vector<16x128xf32> to vector<128xf32>
    %68 = vector.shape_cast %67 : vector<128xf32> to vector<1x128xf32>
    %cst_46 = arith.constant 1.600000e+01 : f32
    %69 = vector.broadcast %cst_46 : f32 to vector<1x128xf32>
    %70 = arith.divf %68, %69 : vector<1x128xf32>
    %71 = vector.broadcast %70 : vector<1x128xf32> to vector<16x128xf32>
    %72 = arith.subf %48, %71 : vector<16x128xf32>
    %73 = arith.mulf %72, %72 : vector<16x128xf32>
    %cst_47 = arith.constant dense<0.000000e+00> : vector<128xf32>
    %74 = vector.multi_reduction <add>, %73, %cst_47 [0] : vector<16x128xf32> to vector<128xf32>
    %75 = vector.shape_cast %74 : vector<128xf32> to vector<1x128xf32>
    %cst_48 = arith.constant 1.600000e+01 : f32
    %76 = vector.broadcast %cst_48 : f32 to vector<1x128xf32>
    %77 = arith.divf %75, %76 : vector<1x128xf32>
    %78 = vector.broadcast %70 : vector<1x128xf32> to vector<16x128xf32>
    %79 = arith.subf %48, %78 : vector<16x128xf32>
    %cst_49 = arith.constant 9.99999974E-6 : f32
    %80 = vector.broadcast %cst_49 : f32 to vector<1x128xf32>
    %81 = arith.addf %77, %80 : vector<1x128xf32>
    %82 = math.rsqrt %81 : vector<1x128xf32>
    %83 = vector.broadcast %82 : vector<1x128xf32> to vector<16x128xf32>
    %84 = arith.mulf %79, %83 : vector<16x128xf32>
    %85 = arith.addf %66, %84 : vector<16x128xf32>
    %86 = arith.truncf %85 : vector<16x128xf32> to vector<16x128xbf16>
    %c1_50 = arith.constant 1 : index
    %c0_51 = arith.constant 0 : index
    %c0_52 = arith.constant 0 : index
    %87 = vector.load %arg4[%c1_50, %c0_51, %c0_52] : memref<4x128x128xbf16, #tpu.memory_space<vmem>>, vector<1x128x128xbf16>
    %88 = vector.shape_cast %87 : vector<1x128x128xbf16> to vector<128x128xbf16>
    %cst_53 = arith.constant dense<0.000000e+00> : vector<16x128xf32>
    %89 = tpu.matmul %86, %88, %cst_53 {dimension_numbers = #tpu.dot_dimension_numbers<[1], [0], [0], [1], [0, 0, 1, 1], [], []>} : vector<16x128xbf16>, vector<128x128xbf16>, vector<16x128xf32> -> vector<16x128xf32>
    %c1_54 = arith.constant 1 : index
    %c0_55 = arith.constant 0 : index
    %c0_56 = arith.constant 0 : index
    %90 = vector.load %arg5[%c1_54, %c0_55, %c0_56] : memref<4x1x128xf32, #tpu.memory_space<vmem>>, vector<1x1x128xf32>
    %91 = vector.shape_cast %90 : vector<1x1x128xf32> to vector<1x128xf32>
    %92 = vector.broadcast %91 : vector<1x128xf32> to vector<16x128xf32>
    %93 = arith.addf %89, %92 : vector<16x128xf32>
    %cst_57 = arith.constant 0.000000e+00 : f32
    %94 = vector.broadcast %cst_57 : f32 to vector<16x128xf32>
    %95 = arith.maximumf %93, %94 : vector<16x128xf32>
    %96 = arith.truncf %95 : vector<16x128xf32> to vector<16x128xbf16>
    %c2_58 = arith.constant 2 : index
    %c0_59 = arith.constant 0 : index
    %c0_60 = arith.constant 0 : index
    %97 = vector.load %arg4[%c2_58, %c0_59, %c0_60] : memref<4x128x128xbf16, #tpu.memory_space<vmem>>, vector<1x128x128xbf16>
    %98 = vector.shape_cast %97 : vector<1x128x128xbf16> to vector<128x128xbf16>
    %cst_61 = arith.constant dense<0.000000e+00> : vector<16x128xf32>
    %99 = tpu.matmul %96, %98, %cst_61 {dimension_numbers = #tpu.dot_dimension_numbers<[1], [0], [0], [1], [0, 0, 1, 1], [], []>} : vector<16x128xbf16>, vector<128x128xbf16>, vector<16x128xf32> -> vector<16x128xf32>
    %c2_62 = arith.constant 2 : index
    %c0_63 = arith.constant 0 : index
    %c0_64 = arith.constant 0 : index
    %100 = vector.load %arg5[%c2_62, %c0_63, %c0_64] : memref<4x1x128xf32, #tpu.memory_space<vmem>>, vector<1x1x128xf32>
    %101 = vector.shape_cast %100 : vector<1x1x128xf32> to vector<1x128xf32>
    %102 = vector.broadcast %101 : vector<1x128xf32> to vector<16x128xf32>
    %103 = arith.addf %99, %102 : vector<16x128xf32>
    %cst_65 = arith.constant 0.000000e+00 : f32
    %104 = vector.broadcast %cst_65 : f32 to vector<16x128xf32>
    %105 = arith.maximumf %103, %104 : vector<16x128xf32>
    %106 = arith.truncf %105 : vector<16x128xf32> to vector<16x128xbf16>
    %c3 = arith.constant 3 : index
    %c0_66 = arith.constant 0 : index
    %c0_67 = arith.constant 0 : index
    %107 = vector.load %arg4[%c3, %c0_66, %c0_67] : memref<4x128x128xbf16, #tpu.memory_space<vmem>>, vector<1x128x128xbf16>
    %108 = vector.shape_cast %107 : vector<1x128x128xbf16> to vector<128x128xbf16>
    %cst_68 = arith.constant dense<0.000000e+00> : vector<16x128xf32>
    %109 = tpu.matmul %106, %108, %cst_68 {dimension_numbers = #tpu.dot_dimension_numbers<[1], [0], [0], [1], [0, 0, 1, 1], [], []>} : vector<16x128xbf16>, vector<128x128xbf16>, vector<16x128xf32> -> vector<16x128xf32>
    %c3_69 = arith.constant 3 : index
    %c0_70 = arith.constant 0 : index
    %c0_71 = arith.constant 0 : index
    %110 = vector.load %arg5[%c3_69, %c0_70, %c0_71] : memref<4x1x128xf32, #tpu.memory_space<vmem>>, vector<1x1x128xf32>
    %111 = vector.shape_cast %110 : vector<1x1x128xf32> to vector<1x128xf32>
    %112 = vector.broadcast %111 : vector<1x128xf32> to vector<16x128xf32>
    %113 = arith.addf %109, %112 : vector<16x128xf32>
    %114 = arith.addf %85, %113 : vector<16x128xf32>
    %c0_72 = arith.constant 0 : index
    %c0_73 = arith.constant 0 : index
    %115 = vector.load %arg6[%c0_72, %c0_73] : memref<16x128xf32, #tpu.memory_space<vmem>>, vector<16x128xf32>
    tpu.vector_store %arg6[%c0_72, %c0_73], %114 {strides = array<i32>} : memref<16x128xf32, #tpu.memory_space<vmem>>, vector<16x128xf32>,
    return
  }
}

</mosaic_0001>

<bundles_post_ra>
// kernel: matchnet_forward.1
= control target key start
LH: loop header
LB: loop body
LE: loop exit
PB: predicated region body
PF: predicated region fallthrough
CT: control target
= control target key end

     0   :  { %11 = vsyncpa [#allocation4], 0  ;;  %s2130_s0 = inlined_call_operand.hbm [shape: f32[16,24], index: 0, kind: input, shape index: {}]   ;;  %s2131_s1 = inlined_call_operand.hbm [shape: f32[16,16], index: 1, kind: input, shape index: {}]   ;;  %s2132_s2 = inlined_call_operand.hbm [shape: bf16[3,256,256], index: 2, kind: input, shape index: {}]   ;;  %s2133_s3 = inlined_call_operand.vmem [shape: f32[3,1,256], index: 3, kind: input, shape index: {}]   ;;  %s2134_s4 = inlined_call_operand.hbm [shape: bf16[4,128,128], index: 4, kind: input, shape index: {}]   ;;  %s2135_s5 = inlined_call_operand.vmem [shape: f32[4,1,128], index: 5, kind: input, shape index: {}]   ;;  %s2136_s6 = inlined_call_operand.vmem [shape: f32[16,128], index: 6, kind: output, shape index: {}]  }
   0x1   :  { %12 = vsyncpa [#allocation6], 0 }
   0x2   :  { %13 = vsyncpa [#allocation9], 0  ;;  %s1923_s21 = smov [#allocation5]   ;;  %s1924_s23 = smov [#allocation3]  }
   0x3   :  { %s31_s22 = sshll.u32 %s1923_s21, 4  ;;  %s19_s24 = sshll.u32 %s1924_s23, 4  ;;  %s32_s22 = int_to_ptr.vmem [resolvable:$true] %s31_s22  ;;  %s1968_s24 = int_to_ptr.vmem [resolvable:$true] %s19_s24 }
   0x4   :  { %s1829_s27 = scalar_lea.hbm %s2131_s1, 256 }
   0x5   :  { %p1830_p0 = scmp.ne.s32.totalorder %s2131_s1, %s1829_s27  ;;  %p1833_p1 = scmp.lt.u32.totalorder %s1829_s27, %s2131_s1 }
   0x7   :  { %p1835_p2 = pnand %p1833_p1, %p1830_p0 }
   0x9   :  { %1838 = shalt.err (!%p1835_p2)
}
   0xa   :  { %s1839_s8 = scalar_lea.vmem %s32_s22, 256  ;;  %p1844_p4 = scmp.lt.s32.totalorder %s32_s22, %s32_s22 }
   0xb   :  { %p1840_p3 = scmp.ne.s32.totalorder %s32_s22, %s1839_s8  ;;  %p1845_p5 = scmp.lt.s32.totalorder %s1839_s8, %s1839_s8 }
   0xd   :  { %p1846_p6 = por %p1845_p5, %p1844_p4 }
   0xf   :  { %p1847_p7 = pnand %p1846_p6, %p1840_p3 }
  0x11   :  { %1850 = shalt.err (!%p1847_p7)
}
  0x12   :  { %s1925_s9 = smov 128   ;;  %s1926_s10 = smov 8  }
  0x13   :  { %37 = dma.hbm_to_vmem [thread:$0]  %s2131_s1, 256, %s32_s22, [#allocation6], %s1925_s9, %s1925_s9, %s1926_s10  }
  0x14   :  { %s1851_s15 = scalar_lea.hbm %s2130_s0, 256 }
  0x15   :  { %p1852_p8 = scmp.ne.s32.totalorder %s2130_s0, %s1851_s15  ;;  %p1855_p9 = scmp.lt.u32.totalorder %s1851_s15, %s2130_s0 }
  0x17   :  { %p1857_p10 = pnand %p1855_p9, %p1852_p8 }
  0x19   :  { %1860 = shalt.err (!%p1857_p10)
}
  0x1a   :  { %s1861_s20 = scalar_lea.vmem %s1968_s24, 256  ;;  %p1866_p12 = scmp.lt.s32.totalorder %s1968_s24, %s1968_s24 }
  0x1b   :  { %p1862_p11 = scmp.ne.s32.totalorder %s1968_s24, %s1861_s20  ;;  %p1867_p13 = scmp.lt.s32.totalorder %s1861_s20, %s1861_s20 }
  0x1d   :  { %p1868_p0 = por %p1867_p13, %p1866_p12 }
  0x1f   :  { %p1869_p1 = pnand %p1868_p0, %p1862_p11 }
  0x21   :  { %1872 = shalt.err (!%p1869_p1)
}
  0x22   :  { %25 = dma.hbm_to_vmem [thread:$0]  %s2130_s0, 256, %s1968_s24, [#allocation4], %s1925_s9, %s1925_s9, %s1926_s10  }
  0x23   :  { %s1927_s22 = smov [#allocation7]   ;;  %s1928_s25 = smov [#allocation8]  }
  0x24   :  { %s43_s23 = sshll.u32 %s1927_s22, 4  ;;  %s57_s26 = sshll.u32 %s1928_s25, 4  ;;  %s44_s23 = int_to_ptr.vmem [resolvable:$true] %s43_s23  ;;  %s2005_s26 = int_to_ptr.vmem [resolvable:$true] %s57_s26 }
  0x25   :  { %s1873_s29 = scalar_lea.hbm %s2132_s2, 12288 }
  0x26   :  { %p1874_p2 = scmp.ne.s32.totalorder %s2132_s2, %s1873_s29  ;;  %p1877_p3 = scmp.lt.u32.totalorder %s1873_s29, %s2132_s2 }
  0x28   :  { %p1879_p4 = pnand %p1877_p3, %p1874_p2 }
  0x2a   :  { %1882 = shalt.err (!%p1879_p4)
}
  0x2b   :  { %s1883_s0 = scalar_lea.vmem %s44_s23, 12288  ;;  %p1888_p6 = scmp.lt.s32.totalorder %s44_s23, %s44_s23 }
  0x2c   :  { %p1884_p5 = scmp.ne.s32.totalorder %s44_s23, %s1883_s0  ;;  %p1889_p7 = scmp.lt.s32.totalorder %s1883_s0, %s1883_s0 }
  0x2e   :  { %p1890_p8 = por %p1889_p7, %p1888_p6 }
  0x30   :  { %p1891_p9 = pnand %p1890_p8, %p1884_p5 }
  0x32   :  { %1894 = shalt.err (!%p1891_p9)
}
  0x33   :  { %49 = dma.hbm_to_vmem [thread:$0]  %s2132_s2, 12288, %s44_s23, [#allocation6], %s1925_s9, %s1925_s9, %s1926_s10  }
  0x34   :  { %s1895_s15 = scalar_lea.hbm %s2134_s4, 4096 }
  0x35   :  { %p1896_p10 = scmp.ne.s32.totalorder %s2134_s4, %s1895_s15  ;;  %p1899_p11 = scmp.lt.u32.totalorder %s1895_s15, %s2134_s4 }
  0x37   :  { %p1901_p12 = pnand %p1899_p11, %p1896_p10 }
  0x39   :  { %1904 = shalt.err (!%p1901_p12)
}
  0x3a   :  { %s1905_s20 = scalar_lea.vmem %s2005_s26, 4096  ;;  %p1910_p0 = scmp.lt.s32.totalorder %s2005_s26, %s2005_s26 }
  0x3b   :  { %p1906_p13 = scmp.ne.s32.totalorder %s2005_s26, %s1905_s20  ;;  %p1911_p1 = scmp.lt.s32.totalorder %s1905_s20, %s1905_s20 }
  0x3d   :  { %p1912_p2 = por %p1911_p1, %p1910_p0 }
  0x3f   :  { %p1913_p3 = pnand %p1912_p2, %p1906_p13 }
  0x41   :  { %1916 = shalt.err (!%p1913_p3)
}
  0x42   :  { %s1929_s2 = smov 64   ;;  %s1930_s9 = smov 4  }
  0x43   :  { %63 = dma.hbm_to_vmem [thread:$0]  %s2134_s4, 4096, %s2005_s26, [#allocation9], %s1929_s2, %s1929_s2, %s1930_s9  }
  0x44   :  { %1917 = dma.done.wait [#allocation4], 256  }
  0x45   :  { %1918 = vsyncadd [#allocation4], 4294967040 }
  0x46   :  { %1919 = dma.done.wait [#allocation6], 12544  }
  0x47   :  { %1920 = vsyncadd [#allocation6], 4294954752 }
  0x48   :  { %1921 = dma.done.wait [#allocation9], 4096  }
  0x49   :  { %1922 = vsyncadd [#allocation9], 4294963200  ;;  %v1931_v0 = vmov 0.0   ;;  %v1649_v1 = vld [vmem:[#allocation7 + $0x4] ss:$8 sps:$4 sm:$0xff]   ;;  %vm90_vm0 = vcmask 130048  }
  0x4a   :  { %80 = vst [vmem:[#allocation2 + $0x8] sm:$0xff] %v1931_v0  ;;  %82 = vst [vmem:[#allocation2 + $0x18] sm:$0xff] %v1931_v0  ;;  %v1651_v2 = vld [vmem:[#allocation7] ss:$8 sps:$4 sm:$0xff]   ;;  %303 = vmatprep.subr.bf16.mxu0 %v1649_v1  ;;  %v1652_v3 = vld [vmem:[#allocation7 + $0x14] ss:$8 sps:$4 sm:$0xff]  }
  0x4b   :  { %79 = vst [vmem:[#allocation2] sm:$0xff] %v1931_v0  ;;  %81 = vst [vmem:[#allocation2 + $0x10] sm:$0xff] %v1931_v0  ;;  %304 = vmatpush1.bf16.msra.mxu0 %v1651_v2  ;;  %v1654_v4 = vld [vmem:[#allocation7 + $0x10] ss:$8 sps:$4 sm:$0xff]   ;;  %v1655_v5 = vld [vmem:[#allocation7 + $0x24] ss:$8 sps:$4 sm:$0xff]  }
  0x4c   :  { %305 = vmatprep.subr.bf16.mxu0 %v1652_v3  ;;  %v1657_v6 = vld [vmem:[#allocation7 + $0x20] ss:$8 sps:$4 sm:$0xff]   ;;  %v1658_v7 = vld [vmem:[#allocation7 + $0x34] ss:$8 sps:$4 sm:$0xff]   ;;  %v1660_v8 = vld [vmem:[#allocation7 + $0x30] ss:$8 sps:$4 sm:$0xff]  }
  0x4d   :  { %v1661_v9 = vld [vmem:[#allocation7 + $0x44] ss:$8 sps:$4 sm:$0xff]   ;;  %v1663_v10 = vld [vmem:[#allocation7 + $0x40] ss:$8 sps:$4 sm:$0xff]   ;;  %v1664_v11 = vld [vmem:[#allocation7 + $0x54] ss:$8 sps:$4 sm:$0xff]  }
  0x4e   :  { %v1666_v12 = vld [vmem:[#allocation7 + $0x50] ss:$8 sps:$4 sm:$0xff]   ;;  %v1667_v13 = vld [vmem:[#allocation7 + $0x64] ss:$8 sps:$4 sm:$0xff]   ;;  %vm85_vm1 = vcmask 195584   ;;  %vm1932_vm2 = vmmov 0  }
  0x4f   :  { %306 = vmatpush1.bf16.msra.mxu0 %v1654_v4  ;;  %v1669_v14 = vld [vmem:[#allocation7 + $0x60] ss:$8 sps:$4 sm:$0xff]   ;;  %v88_v15 = vld [vmem:[#allocation5] sm:$0xff]  ;;  %v89_v16 = vld [vmem:[#allocation5 + $0x8] sm:$0xff] }
  0x50   :  { %307 = vmatprep.subr.bf16.mxu0 %v1655_v5  ;;  %v1670_v17 = vld [vmem:[#allocation7 + $0x74] ss:$8 sps:$4 sm:$0xff]   ;;  %91 = vst.msk [vmem:[#allocation2 + $0x8] sm:$0xff] %vm90_vm0, %v88_v15  ;;  %92 = vst.msk [vmem:[#allocation2 + $0x18] sm:$0xff] %vm90_vm0, %v89_v16  ;;  %v83_v18 = vld [vmem:[#allocation3] sm:$0xff] }
  0x51   :  { %v84_v19 = vld [vmem:[#allocation3 + $0x8] sm:$0xff]  ;;  %86 = vst.msk [vmem:[#allocation2] sm:$0xff] %vm85_vm1, %v83_v18  ;;  %v1700_v22 = vld [vmem:[#allocation7 + $0x114] ss:$8 sps:$4 sm:$0xff]   ;;  %v1702_v23 = vld [vmem:[#allocation7 + $0x110] ss:$8 sps:$4 sm:$0xff]  }
  0x52   :  { %87 = vst.msk [vmem:[#allocation2 + $0x10] sm:$0xff] %vm85_vm1, %v84_v19  ;;  %v1697_v20 = vld [vmem:[#allocation7 + $0x104] ss:$8 sps:$4 sm:$0xff]   ;;  %v1699_v21 = vld [vmem:[#allocation7 + $0x100] ss:$8 sps:$4 sm:$0xff]  }
  0x53   :  { %308 = vmatpush1.bf16.msra.mxu0 %v1657_v6  ;;  %558 = vmatprep.subr.bf16.mxu1 %v1697_v20  ;;  %v1672_v24 = vld [vmem:[#allocation7 + $0x70] ss:$8 sps:$4 sm:$0xff]   ;;  %v1703_v25 = vld [vmem:[#allocation7 + $0x124] ss:$8 sps:$4 sm:$0xff]   ;;  %v1705_v30 = vld [vmem:[#allocation7 + $0x120] ss:$8 sps:$4 sm:$0xff]  }
  0x54   :  { %309 = vmatprep.subr.bf16.mxu0 %v1658_v7  ;;  %559 = vmatpush1.bf16.msra.mxu1 %v1699_v21  ;;  %v1673_v26 = vld [vmem:[#allocation7 + $0x84] ss:$8 sps:$4 sm:$0xff]   ;;  %v1675_v31 = vld [vmem:[#allocation7 + $0x80] ss:$8 sps:$4 sm:$0xff]   ;;  %v1706_v32 = vld [vmem:[#allocation7 + $0x134] ss:$8 sps:$4 sm:$0xff]  }
  0x55   :  { %560 = vmatprep.subr.bf16.mxu1 %v1700_v22  ;;  %v1676_v33 = vld [vmem:[#allocation7 + $0x94] ss:$8 sps:$4 sm:$0xff]   ;;  %v1708_v34 = vld [vmem:[#allocation7 + $0x130] ss:$8 sps:$4 sm:$0xff]   ;;  %v1709_v36 = vld [vmem:[#allocation7 + $0x144] ss:$8 sps:$4 sm:$0xff]  }
  0x56   :  { %v1678_v35 = vld [vmem:[#allocation7 + $0x90] ss:$8 sps:$4 sm:$0xff]   ;;  %v1679_v37 = vld [vmem:[#allocation7 + $0xa4] ss:$8 sps:$4 sm:$0xff]   ;;  %v1711_v38 = vld [vmem:[#allocation7 + $0x140] ss:$8 sps:$4 sm:$0xff]  }
  0x57   :  { %310 = vmatpush1.bf16.msra.mxu0 %v1660_v8  ;;  %v94_v27 = vld [vmem:[#allocation2 + $0x8] sm:$0xff]  ;;  %v96_v28 = vld [vmem:[#allocation2 + $0x18] sm:$0xff] }
  0x58   :  { %311 = vmatprep.subr.bf16.mxu0 %v1661_v9  ;;  %v98_v29 = vpack.c.bf16 %v96_v28, %v94_v27  ;;  %561 = vmatpush1.bf16.msra.mxu1 %v1702_v23  ;;  %v1681_v39 = vld [vmem:[#allocation7 + $0xa0] ss:$8 sps:$4 sm:$0xff]   ;;  %v1712_v40 = vld [vmem:[#allocation7 + $0x154] ss:$8 sps:$4 sm:$0xff]   ;;  %v1684_v42 = vld [vmem:[#allocation7 + $0xb0] ss:$8 sps:$4 sm:$0xff]  }
  0x59   :  { %562 = vmatprep.subr.bf16.mxu1 %v1703_v25  ;;  %v1682_v41 = vld [vmem:[#allocation7 + $0xb4] ss:$8 sps:$4 sm:$0xff]   ;;  %v1685_v43 = vld [vmem:[#allocation7 + $0xc4] ss:$8 sps:$4 sm:$0xff]   ;;  %v1714_v44 = vld [vmem:[#allocation7 + $0x150] ss:$8 sps:$4 sm:$0xff]  }
  0x5a   :  { %335 = vmatprep.mubr.bf16.mxu0 %v98_v29  ;;  %v1715_v45 = vld [vmem:[#allocation7 + $0x164] ss:$8 sps:$4 sm:$0xff]   ;;  %v1717_v46 = vld [vmem:[#allocation7 + $0x160] ss:$8 sps:$4 sm:$0xff]   ;;  %v1718_v48 = vld [vmem:[#allocation7 + $0x174] ss:$8 sps:$4 sm:$0xff]  }
  0x5b   :  { %312 = vmatpush1.bf16.msra.mxu0 %v1663_v10  ;;  %v1687_v47 = vld [vmem:[#allocation7 + $0xc0] ss:$8 sps:$4 sm:$0xff]   ;;  %v1688_v49 = vld [vmem:[#allocation7 + $0xd4] ss:$8 sps:$4 sm:$0xff]   ;;  %v1720_v50 = vld [vmem:[#allocation7 + $0x170] ss:$8 sps:$4 sm:$0xff]  }
  0x5c   :  { %313 = vmatprep.subr.bf16.mxu0 %v1664_v11  ;;  %563 = vmatpush1.bf16.msra.mxu1 %v1705_v30  ;;  %v1690_v51 = vld [vmem:[#allocation7 + $0xd0] ss:$8 sps:$4 sm:$0xff]   ;;  %v1721_v52 = vld [vmem:[#allocation7 + $0x184] ss:$8 sps:$4 sm:$0xff]   ;;  %v1723_v54 = vld [vmem:[#allocation7 + $0x180] ss:$8 sps:$4 sm:$0xff]  }
  0x5d   :  { %564 = vmatprep.subr.bf16.mxu1 %v1706_v32  ;;  %v1691_v53 = vld [vmem:[#allocation7 + $0xe4] ss:$8 sps:$4 sm:$0xff]   ;;  %v1693_v55 = vld [vmem:[#allocation7 + $0xe0] ss:$8 sps:$4 sm:$0xff]   ;;  %v1724_v56 = vld [vmem:[#allocation7 + $0x194] ss:$8 sps:$4 sm:$0xff]  }
  0x5e   :  { %v1694_v57 = vld [vmem:[#allocation7 + $0xf4] ss:$8 sps:$4 sm:$0xff]   ;;  %v1726_v58 = vld [vmem:[#allocation7 + $0x190] ss:$8 sps:$4 sm:$0xff]   ;;  %v93_v60 = vld [vmem:[#allocation2] sm:$0xff] }
  0x5f   :  { %314 = vmatpush1.bf16.msra.mxu0 %v1666_v12  ;;  %v1696_v59 = vld [vmem:[#allocation7 + $0xf0] ss:$8 sps:$4 sm:$0xff]   ;;  %v1727_v62 = vld [vmem:[#allocation7 + $0x1a4] ss:$8 sps:$4 sm:$0xff]   ;;  %v1729_v63 = vld [vmem:[#allocation7 + $0x1a0] ss:$8 sps:$4 sm:$0xff]  }
  0x60   :  { %315 = vmatprep.subr.bf16.mxu0 %v1667_v13  ;;  %565 = vmatpush1.bf16.msra.mxu1 %v1708_v34  ;;  %v95_v61 = vld [vmem:[#allocation2 + $0x10] sm:$0xff]  ;;  %v1733_v4 = vld [vmem:[#allocation7 + $0x1c4] ss:$8 sps:$4 sm:$0xff]   ;;  %v1735_v5 = vld [vmem:[#allocation7 + $0x1c0] ss:$8 sps:$4 sm:$0xff]  }
  0x61   :  { %566 = vmatprep.subr.bf16.mxu1 %v1709_v36  ;;  %v1730_v1 = vld [vmem:[#allocation7 + $0x1b4] ss:$8 sps:$4 sm:$0xff]   ;;  %v97_v2 = vpack.c.bf16 %v95_v61, %v93_v60  ;;  %v1732_v3 = vld [vmem:[#allocation7 + $0x1b0] ss:$8 sps:$4 sm:$0xff]   ;;  %v1739_v8 = vld [vmem:[#allocation7 + $0x1e4] ss:$8 sps:$4 sm:$0xff]  }
  0x62   :  { %v1736_v6 = vld [vmem:[#allocation7 + $0x1d4] ss:$8 sps:$4 sm:$0xff]   ;;  %v1738_v7 = vld [vmem:[#allocation7 + $0x1d0] ss:$8 sps:$4 sm:$0xff]   ;;  %v1741_v9 = vld [vmem:[#allocation7 + $0x1e0] ss:$8 sps:$4 sm:$0xff]  }
  0x63   :  { %316 = vmatpush1.bf16.msra.mxu0 %v1669_v14  ;;  %v1742_v10 = vld [vmem:[#allocation7 + $0x1f4] ss:$8 sps:$4 sm:$0xff]   ;;  %v1744_v11 = vld [vmem:[#allocation7 + $0x1f0] ss:$8 sps:$4 sm:$0xff]   ;;  %v1745_v12 = vld [vmem:[#allocation7 + $0x200] ss:$8 sps:$4 sm:$0xff]  }
  0x64   :  { %317 = vmatprep.subr.bf16.mxu0 %v1670_v17  ;;  %567 = vmatpush1.bf16.msra.mxu1 %v1711_v38  ;;  %v1747_v13 = vld [vmem:[#allocation7 + $0x204] ss:$8 sps:$4 sm:$0xff]   ;;  %v1750_v14 = vld [vmem:[#allocation7 + $0x214] ss:$8 sps:$4 sm:$0xff]   ;;  %v1748_v15 = vld [vmem:[#allocation7 + $0x210] ss:$8 sps:$4 sm:$0xff]  }
  0x65   :  { %568 = vmatprep.subr.bf16.mxu1 %v1712_v40  ;;  %v1753_v16 = vld [vmem:[#allocation7 + $0x224] ss:$8 sps:$4 sm:$0xff]   ;;  %v1751_v17 = vld [vmem:[#allocation7 + $0x220] ss:$8 sps:$4 sm:$0xff]   ;;  %v1756_v18 = vld [vmem:[#allocation7 + $0x234] ss:$8 sps:$4 sm:$0xff]   ;;  %v133_v40 = vlaneseq }
  0x66   :  { %v1754_v19 = vld [vmem:[#allocation7 + $0x230] ss:$8 sps:$4 sm:$0xff]   ;;  %v1759_v20 = vld [vmem:[#allocation7 + $0x244] ss:$8 sps:$4 sm:$0xff]   ;;  %v1757_v21 = vld [vmem:[#allocation7 + $0x240] ss:$8 sps:$4 sm:$0xff]  }
  0x67   :  { %318 = vmatpush1.bf16.msra.mxu0 %v1672_v24  ;;  %v1762_v22 = vld [vmem:[#allocation7 + $0x254] ss:$8 sps:$4 sm:$0xff]   ;;  %v1760_v23 = vld [vmem:[#allocation7 + $0x250] ss:$8 sps:$4 sm:$0xff]   ;;  %v1765_v24 = vld [vmem:[#allocation7 + $0x264] ss:$8 sps:$4 sm:$0xff]  }
  0x68   :  { %319 = vmatprep.subr.bf16.mxu0 %v1673_v26  ;;  %569 = vmatpush1.bf16.msra.mxu1 %v1714_v44  ;;  %v1763_v25 = vld [vmem:[#allocation7 + $0x260] ss:$8 sps:$4 sm:$0xff]   ;;  %v1768_v26 = vld [vmem:[#allocation7 + $0x274] ss:$8 sps:$4 sm:$0xff]   ;;  %v1766_v27 = vld [vmem:[#allocation7 + $0x270] ss:$8 sps:$4 sm:$0xff]  }
  0x69   :  { %570 = vmatprep.subr.bf16.mxu1 %v1715_v45  ;;  %v1771_v28 = vld [vmem:[#allocation7 + $0x284] ss:$8 sps:$4 sm:$0xff]   ;;  %v1769_v29 = vld [vmem:[#allocation7 + $0x280] ss:$8 sps:$4 sm:$0xff]   ;;  %v1774_v30 = vld [vmem:[#allocation7 + $0x294] ss:$8 sps:$4 sm:$0xff]  }
  0x6a   :  { %v1777_v32 = vld [vmem:[#allocation7 + $0x2a4] ss:$8 sps:$4 sm:$0xff]   ;;  %v1780_v34 = vld [vmem:[#allocation7 + $0x2b4] ss:$8 sps:$4 sm:$0xff]  }
  0x6b   :  { %320 = vmatpush1.bf16.msra.mxu0 %v1675_v31  ;;  %v1772_v31 = vld [vmem:[#allocation7 + $0x290] ss:$8 sps:$4 sm:$0xff]   ;;  %v1783_v36 = vld [vmem:[#allocation7 + $0x2c4] ss:$8 sps:$4 sm:$0xff]   ;;  %v1786_v38 = vld [vmem:[#allocation7 + $0x2d4] ss:$8 sps:$4 sm:$0xff]  }
  0x6c   :  { %321 = vmatprep.subr.bf16.mxu0 %v1676_v33  ;;  %571 = vmatpush1.bf16.msra.mxu1 %v1717_v46  ;;  %v1775_v33 = vld [vmem:[#allocation7 + $0x2a0] ss:$8 sps:$4 sm:$0xff]   ;;  %v1789_v61 = vld [vmem:[#allocation7 + $0x2e4] ss:$8 sps:$4 sm:$0xff]  }
  0x6d   :  { %572 = vmatprep.subr.bf16.mxu1 %v1718_v48 }
  0x6f   :  { %322 = vmatpush1.bf16.msra.mxu0 %v1678_v35  ;;  %v1778_v35 = vld [vmem:[#allocation7 + $0x2b0] ss:$8 sps:$4 sm:$0xff]  }
  0x70   :  { %323 = vmatprep.subr.bf16.mxu0 %v1679_v37  ;;  %573 = vmatpush1.bf16.msra.mxu1 %v1720_v50  ;;  %v1781_v37 = vld [vmem:[#allocation7 + $0x2c0] ss:$8 sps:$4 sm:$0xff]  }
  0x71   :  { %574 = vmatprep.subr.bf16.mxu1 %v1721_v52 }
  0x73   :  { %324 = vmatpush1.bf16.msra.mxu0 %v1681_v39  ;;  %v1784_v39 = vld [vmem:[#allocation7 + $0x2d0] ss:$8 sps:$4 sm:$0xff]  }
  0x74   :  { %325 = vmatprep.subr.bf16.mxu0 %v1682_v41  ;;  %575 = vmatpush1.bf16.msra.mxu1 %v1723_v54  ;;  %v134_v41 = vshrl.u32 %v133_v40, 7 }
  0x75   :  { %576 = vmatprep.subr.bf16.mxu1 %v1724_v56 }
  0x76   :  { %v2049_v44 = vsub.s32 1, %v134_v41 }
  0x77   :  { %326 = vmatpush1.bf16.msra.mxu0 %v1684_v42  ;;  %v2044_v42 = vsub.s32 0, %v134_v41 }
  0x78   :  { %327 = vmatprep.subr.bf16.mxu0 %v1685_v43  ;;  %577 = vmatpush1.bf16.msra.mxu1 %v1726_v58  ;;  %v131_v43 = vld [vmem:[%s2133_s3] sm:$0x3] }
  0x79   :  { %578 = vmatprep.subr.bf16.mxu1 %v1727_v62  ;;  %v136_v45 = vrot.slane %v131_v43, %v2044_v42  ;;  %v140_v46 = vrot.slane %v131_v43, %v2049_v44  ;;  %v1787_v62 = vld [vmem:[#allocation7 + $0x2e0] ss:$8 sps:$4 sm:$0xff]  }
  0x7b   :  { %328 = vmatpush1.bf16.msra.mxu0 %v1687_v47 }
  0x7c   :  { %329 = vmatprep.subr.bf16.mxu0 %v1688_v49  ;;  %579 = vmatpush1.bf16.msra.mxu1 %v1729_v63  ;;  %v1792_v63 = vld [vmem:[#allocation7 + $0x2f4] ss:$8 sps:$4 sm:$0xff]  }
  0x7d   :  { %580 = vmatprep.subr.bf16.mxu1 %v1730_v1  ;;  %v1790_v1 = vld [vmem:[#allocation7 + $0x2f0] ss:$8 sps:$4 sm:$0xff]  }
  0x7f   :  { %330 = vmatpush1.bf16.msra.mxu0 %v1690_v51 }
  0x80   :  { %331 = vmatprep.subr.bf16.mxu0 %v1691_v53  ;;  %581 = vmatpush1.bf16.msra.mxu1 %v1732_v3  ;;  %v1794_v3 = vld [vmem:[#allocation8 + $0x8] sm:$0xff]  }
  0x81   :  { %582 = vmatprep.subr.bf16.mxu1 %v1733_v4  ;;  %v1795_v4 = vld [vmem:[#allocation8 + $0x10] sm:$0xff]  }
  0x83   :  { %332 = vmatpush1.bf16.msra.mxu0 %v1693_v55 }
  0x84   :  { %333 = vmatprep.subr.bf16.mxu0 %v1694_v57  ;;  %583 = vmatpush1.bf16.msra.mxu1 %v1735_v5  ;;  %v1796_v5 = vld [vmem:[#allocation8 + $0x18] sm:$0xff]  }
  0x85   :  { %584 = vmatprep.subr.bf16.mxu1 %v1736_v6  ;;  %v1797_v6 = vld [vmem:[#allocation8 + $0x20] sm:$0xff]  }
  0x87   :  { %334 = vmatpush1.bf16.msra.mxu0 %v1696_v59 }
  0x88   :  { %585 = vmatpush1.bf16.msra.mxu1 %v1738_v7  ;;  %813 = vmatprep.subr.bf16.mxu0 %v1747_v13  ;;  %v1798_v7 = vld [vmem:[#allocation8 + $0x28] sm:$0xff]  }
  0x89   :  { %586 = vmatprep.subr.bf16.mxu1 %v1739_v8  ;;  %v1418_v8 = vld [vmem:[%s2133_s3 + $0x2] sm:$0x3] }
  0x8a   :  { %336 = vmatmul.mubr.bf16.vlgmr.msra.gmra.mrb[0].mxu0 %v97_v2  ;;  %v1793_v2 = vld [vmem:[#allocation8] sm:$0xff]  }
  0x8b   :  { %814 = vmatpush1.bf16.msra.mxu0 %v1745_v12 }
  0x8c   :  { %587 = vmatpush1.bf16.msra.mxu1 %v1741_v9  ;;  %815 = vmatprep.subr.bf16.mxu0 %v1750_v14  ;;  %v391_v9 = vrot.slane %v1418_v8, %v2044_v42 }
  0x8d   :  { %588 = vmatprep.subr.bf16.mxu1 %v1742_v10  ;;  %v395_v10 = vrot.slane %v1418_v8, %v2049_v44  ;;  %v1805_v8 = vld [vmem:[#allocation8 + $0x60] sm:$0xff]  }
  0x8f   :  { %816 = vmatpush1.bf16.msra.mxu0 %v1748_v15 }
  0x90   :  { %589 = vmatpush1.bf16.msra.mxu1 %v1744_v11  ;;  %817 = vmatprep.subr.bf16.mxu0 %v1753_v16 }
  0x91   :  { %1559 = vmatprep.subr.bf16.mxu1 %v1931_v0 }
  0x93   :  { %818 = vmatpush1.bf16.msra.mxu0 %v1751_v17 }
  0x94   :  { %819 = vmatprep.subr.bf16.mxu0 %v1756_v18 }
  0x97   :  { %820 = vmatpush1.bf16.msra.mxu0 %v1754_v19 }
  0x98   :  { %821 = vmatprep.subr.bf16.mxu0 %v1759_v20 }
  0x9b   :  { %822 = vmatpush1.bf16.msra.mxu0 %v1757_v21 }
  0x9c   :  { %823 = vmatprep.subr.bf16.mxu0 %v1762_v22 }
  0x9f   :  { %824 = vmatpush1.bf16.msra.mxu0 %v1760_v23 }
  0xa0   :  { %825 = vmatprep.subr.bf16.mxu0 %v1765_v24 }
  0xa3   :  { %826 = vmatpush1.bf16.msra.mxu0 %v1763_v25  ;;  %v1799_v25 = vld [vmem:[#allocation8 + $0x30] sm:$0xff]  }
  0xa4   :  { %827 = vmatprep.subr.bf16.mxu0 %v1768_v26  ;;  %v1800_v26 = vld [vmem:[#allocation8 + $0x38] sm:$0xff]  }
  0xa7   :  { %828 = vmatpush1.bf16.msra.mxu0 %v1766_v27  ;;  %v1451_v27 = vld [vmem:[%s2133_s3 + $0x4] sm:$0x3] }
  0xa8   :  { %829 = vmatprep.subr.bf16.mxu0 %v1771_v28  ;;  %v646_v28 = vrot.slane %v1451_v27, %v2044_v42 }
  0xab   :  { %830 = vmatpush1.bf16.msra.mxu0 %v1769_v29  ;;  %v650_v29 = vrot.slane %v1451_v27, %v2049_v44 }
  0xac   :  { %831 = vmatprep.subr.bf16.mxu0 %v1774_v30 }
  0xaf   :  { %832 = vmatpush1.bf16.msra.mxu0 %v1772_v31 }
  0xb0   :  { %833 = vmatprep.subr.bf16.mxu0 %v1777_v32 }
  0xb3   :  { %834 = vmatpush1.bf16.msra.mxu0 %v1775_v33 }
  0xb4   :  { %835 = vmatprep.subr.bf16.mxu0 %v1780_v34 }
  0xb7   :  { %836 = vmatpush1.bf16.msra.mxu0 %v1778_v35 }
  0xb8   :  { %837 = vmatprep.subr.bf16.mxu0 %v1783_v36 }
  0xbb   :  { %838 = vmatpush1.bf16.msra.mxu0 %v1781_v37 }
  0xbc   :  { %839 = vmatprep.subr.bf16.mxu0 %v1786_v38 }
  0xbf   :  { %840 = vmatpush1.bf16.msra.mxu0 %v1784_v39 }
  0xc0   :  { %841 = vmatprep.subr.bf16.mxu0 %v1789_v61 }
  0xc3   :  { %842 = vmatpush1.bf16.msra.mxu0 %v1787_v62 }
  0xc4   :  { %843 = vmatprep.subr.bf16.mxu0 %v1792_v63 }
  0xc7   :  { %844 = vmatpush1.bf16.msra.mxu0 %v1790_v1 }
  0xc8   :  { %1599 = vmatprep.subr.bf16.mxu0 %v1931_v0 }
 0x15d   :  { %v337_v47 = vpop.f32.mrb[0].mxu0 }
 0x15e   :  { %v338_v48 = vadd.f32 %v337_v47, %v136_v45  ;;  %v339_v49 = vpop.f32.mrb[1].mxu0 }
 0x15f   :  { %v340_v50 = vadd.f32 %v339_v49, %v140_v46  ;;  %v341_v51 = vpop.f32.mrb[2].mxu0 }
 0x160   :  { %v342_v52 = vadd.f32 %v341_v51, %v136_v45  ;;  %v343_v53 = vpop.f32.mrb[3].mxu0  ;;  %v346_v55 = vmax.f32 %v338_v48, 0.0 }
 0x161   :  { %v344_v54 = vadd.f32 %v343_v53, %v140_v46  ;;  %v347_v57 = vmax.f32 %v340_v50, 0.0 }
 0x162   :  { %v348_v56 = vmax.f32 %v342_v52, 0.0 }
 0x163   :  { %v349_v58 = vmax.f32 %v344_v54, 0.0 }
 0x164   :  { %v350_v59 = vpack.c.bf16 %v348_v56, %v346_v55 }
 0x165   :  { %v351_v60 = vpack.c.bf16 %v349_v58, %v347_v57 }
 0x167   :  { %590 = vmatprep.mubr.bf16.mxu1 %v351_v60 }
 0x168   :  { %591 = vmatmul.mubr.bf16.vlgmr.msra.gmra.mrb[0].mxu1 %v350_v59 }
 0x169   :  { %1560 = vmatpush3.bf16.msra.mxu1 %v1793_v2  ;;  %1575 = vmatprep.mubr.msk.bf16.mxu1 %vm1932_vm2, %v1931_v0 }
 0x16a   :  { %1561 = vmatprep.subr.bf16.mxu1 %v1931_v0 }
 0x16d   :  { %1562 = vmatpush3.bf16.msra.mxu1 %v1794_v3 }
 0x16e   :  { %1563 = vmatprep.subr.bf16.mxu1 %v1931_v0 }
 0x171   :  { %1564 = vmatpush3.bf16.msra.mxu1 %v1795_v4  ;;  %v1801_v4 = vld [vmem:[#allocation8 + $0x40] sm:$0xff]  }
 0x172   :  { %1565 = vmatprep.subr.bf16.mxu1 %v1931_v0 }
 0x175   :  { %1566 = vmatpush3.bf16.msra.mxu1 %v1796_v5  ;;  %v1802_v5 = vld [vmem:[#allocation8 + $0x48] sm:$0xff]  }
 0x176   :  { %1567 = vmatprep.subr.bf16.mxu1 %v1931_v0 }
 0x179   :  { %1568 = vmatpush3.bf16.msra.mxu1 %v1797_v6  ;;  %v1803_v6 = vld [vmem:[#allocation8 + $0x50] sm:$0xff]  }
 0x17a   :  { %1569 = vmatprep.subr.bf16.mxu1 %v1931_v0 }
 0x17d   :  { %1570 = vmatpush3.bf16.msra.mxu1 %v1798_v7  ;;  %v1804_v7 = vld [vmem:[#allocation8 + $0x58] sm:$0xff]  }
 0x17e   :  { %1571 = vmatprep.subr.bf16.mxu1 %v1931_v0 }
 0x181   :  { %1572 = vmatpush3.bf16.msra.mxu1 %v1799_v25 }
 0x182   :  { %1573 = vmatprep.subr.bf16.mxu1 %v1931_v0 }
 0x185   :  { %1574 = vmatpush3.bf16.msra.mxu1 %v1800_v26 }
 0x186   :  { %1579 = vmatprep.subr.bf16.mxu1 %v1931_v0 }
 0x23b   :  { %v592_v11 = vpop.f32.mrb[0].mxu1 }
 0x23c   :  { %v593_v12 = vadd.f32 %v592_v11, %v391_v9  ;;  %v594_v13 = vpop.f32.mrb[1].mxu1  ;;  %v1808_v11 = vld [vmem:[#allocation8 + $0x78] sm:$0xff]  }
 0x23d   :  { %v595_v14 = vadd.f32 %v594_v13, %v395_v10  ;;  %v596_v15 = vpop.f32.mrb[2].mxu1  ;;  %v1810_v13 = vld [vmem:[#allocation8 + $0x88] sm:$0xff]  }
 0x23e   :  { %v597_v16 = vadd.f32 %v596_v15, %v391_v9  ;;  %v598_v17 = vpop.f32.mrb[3].mxu1  ;;  %v601_v19 = vmax.f32 %v593_v12, 0.0  ;;  %v1806_v9 = vld [vmem:[#allocation8 + $0x68] sm:$0xff]   ;;  %v1809_v12 = vld [vmem:[#allocation8 + $0x80] sm:$0xff]   ;;  %v1812_v15 = vld [vmem:[#allocation8 + $0x98] sm:$0xff]  }
 0x23f   :  { %v599_v18 = vadd.f32 %v598_v17, %v395_v10  ;;  %v602_v21 = vmax.f32 %v595_v14, 0.0  ;;  %v1807_v10 = vld [vmem:[#allocation8 + $0x70] sm:$0xff]   ;;  %v1814_v17 = vld [vmem:[#allocation8 + $0xa8] sm:$0xff]  }
 0x240   :  { %v603_v20 = vmax.f32 %v597_v16, 0.0  ;;  %v1811_v14 = vld [vmem:[#allocation8 + $0x90] sm:$0xff]   ;;  %v1813_v16 = vld [vmem:[#allocation8 + $0xa0] sm:$0xff]  }
 0x241   :  { %v604_v22 = vmax.f32 %v599_v18, 0.0  ;;  %v1484_v18 = vld [vmem:[%s2135_s5] ss:$0 sm:$0xff] }
 0x242   :  { %v605_v23 = vpack.c.bf16 %v603_v20, %v601_v19 }
 0x243   :  { %v606_v24 = vpack.c.bf16 %v604_v22, %v602_v21 }
 0x245   :  { %845 = vmatprep.mubr.bf16.mxu0 %v606_v24 }
 0x246   :  { %846 = vmatmul.mubr.bf16.vlgmr.msra.gmra.mrb[4].mxu0 %v605_v23 }
 0x247   :  { %1615 = vmatprep.mubr.msk.bf16.mxu0 %vm1932_vm2, %v1931_v0  ;;  %1600 = vmatpush3.bf16.msra.mxu0 %v1809_v12 }
 0x248   :  { %1601 = vmatprep.subr.bf16.mxu0 %v1931_v0 }
 0x24b   :  { %1602 = vmatpush3.bf16.msra.mxu0 %v1810_v13 }
 0x24c   :  { %1603 = vmatprep.subr.bf16.mxu0 %v1931_v0 }
 0x24f   :  { %1604 = vmatpush3.bf16.msra.mxu0 %v1811_v14 }
 0x250   :  { %1605 = vmatprep.subr.bf16.mxu0 %v1931_v0 }
 0x253   :  { %1606 = vmatpush3.bf16.msra.mxu0 %v1812_v15 }
 0x254   :  { %1607 = vmatprep.subr.bf16.mxu0 %v1931_v0 }
 0x257   :  { %1608 = vmatpush3.bf16.msra.mxu0 %v1813_v16 }
 0x258   :  { %1609 = vmatprep.subr.bf16.mxu0 %v1931_v0 }
 0x25b   :  { %1610 = vmatpush3.bf16.msra.mxu0 %v1814_v17 }
 0x25c   :  { %1611 = vmatprep.subr.bf16.mxu0 %v1931_v0 }
 0x319   :  { %v847_v30 = vpop.f32.mrb[4].mxu0 }
 0x31a   :  { %v848_v31 = vadd.f32 %v847_v30, %v646_v28  ;;  %v849_v32 = vpop.f32.mrb[5].mxu0 }
 0x31b   :  { %v850_v33 = vadd.f32 %v849_v32, %v650_v29  ;;  %v851_v34 = vpop.f32.mrb[6].mxu0 }
 0x31c   :  { %v852_v35 = vadd.f32 %v851_v34, %v646_v28  ;;  %v853_v36 = vpop.f32.mrb[7].mxu0  ;;  %v856_v38 = vmax.f32 %v848_v31, 0.0 }
 0x31d   :  { %v854_v37 = vadd.f32 %v853_v36, %v650_v29  ;;  %v857_v40 = vmax.f32 %v850_v33, 0.0 }
 0x31e   :  { %v858_v39 = vmax.f32 %v852_v35, 0.0 }
 0x31f   :  { %v859_v41 = vmax.f32 %v854_v37, 0.0 }
 0x320   :  { %v975_v43 = vadd.f32 %v858_v39, %v856_v38 }
 0x321   :  { %v860_v45 = vpack.c.bf16 %v859_v41, %v857_v40 }
 0x322   :  { %v976_v46 = vrot.slane %v975_v43, 4 }
 0x323   :  { %1576 = vmatmul.mubr.bf16.vlgmr.msra.gmra.mrb[4].mxu1 %v860_v45 }
 0x324   :  { %v977_v47 = vadd.f32 %v976_v46, %v975_v43  ;;  %1595 = vmatprep.mubr.msk.bf16.mxu1 %vm1932_vm2, %v1931_v0  ;;  %1580 = vmatpush3.bf16.msra.mxu1 %v1801_v4 }
 0x325   :  { %1581 = vmatprep.subr.bf16.mxu1 %v1931_v0 }
 0x326   :  { %v978_v42 = vrot.slane %v977_v47, 2 }
 0x328   :  { %v979_v44 = vadd.f32 %v978_v42, %v977_v47  ;;  %1582 = vmatpush3.bf16.msra.mxu1 %v1802_v5 }
 0x329   :  { %1583 = vmatprep.subr.bf16.mxu1 %v1931_v0 }
 0x32a   :  { %v980_v48 = vrot.slane %v979_v44, 1 }
 0x32c   :  { %v981_v49 = vadd.f32 %v980_v48, %v979_v44  ;;  %1584 = vmatpush3.bf16.msra.mxu1 %v1803_v6 }
 0x32d   :  { %1585 = vmatprep.subr.bf16.mxu1 %v1931_v0 }
 0x32e   :  { %v983_v50 = vmul.f32 0.0625, %v981_v49 }
 0x330   :  { %v984_v51 = vsub.f32 %v856_v38, %v983_v50  ;;  %v985_v52 = vsub.f32 %v858_v39, %v983_v50  ;;  %1586 = vmatpush3.bf16.msra.mxu1 %v1804_v7 }
 0x331   :  { %1587 = vmatprep.subr.bf16.mxu1 %v1931_v0 }
 0x332   :  { %v986_v53 = vmul.f32 %v984_v51, %v984_v51  ;;  %v987_v54 = vmul.f32 %v985_v52, %v985_v52 }
 0x334   :  { %v988_v55 = vadd.f32 %v987_v54, %v986_v53  ;;  %1588 = vmatpush3.bf16.msra.mxu1 %v1805_v8  ;;  %v1815_v54 = vld [vmem:[#allocation8 + $0xb0] sm:$0xff]  }
 0x335   :  { %1589 = vmatprep.subr.bf16.mxu1 %v1931_v0  ;;  %1612 = vmatpush3.bf16.msra.mxu0 %v1815_v54 }
 0x336   :  { %v989_v56 = vrot.slane %v988_v55, 4  ;;  %1613 = vmatprep.subr.bf16.mxu0 %v1931_v0 }
 0x338   :  { %v990_v57 = vadd.f32 %v989_v56, %v988_v55  ;;  %1590 = vmatpush3.bf16.msra.mxu1 %v1806_v9  ;;  %v1816_v55 = vld [vmem:[#allocation8 + $0xb8] sm:$0xff]   ;;  %v1817_v56 = vld [vmem:[#allocation8 + $0xc0] sm:$0xff]   ;;  %v1823_v9 = vld [vmem:[#allocation8 + $0xf0] sm:$0xff]  }
 0x339   :  { %1591 = vmatprep.subr.bf16.mxu1 %v1931_v0  ;;  %1614 = vmatpush3.bf16.msra.mxu0 %v1816_v55 }
 0x33a   :  { %v991_v58 = vrot.slane %v990_v57, 2 }
 0x33c   :  { %v992_v59 = vadd.f32 %v991_v58, %v990_v57  ;;  %1592 = vmatpush3.bf16.msra.mxu1 %v1807_v10  ;;  %v1818_v57 = vld [vmem:[#allocation8 + $0xc8] sm:$0xff]   ;;  %v1819_v58 = vld [vmem:[#allocation8 + $0xd0] sm:$0xff]   ;;  %v1824_v10 = vld [vmem:[#allocation8 + $0xf8] sm:$0xff]  }
 0x33d   :  { %1593 = vmatprep.subr.bf16.mxu1 %v1931_v0 }
 0x33e   :  { %v993_v60 = vrot.slane %v992_v59, 1 }
 0x340   :  { %v994_v61 = vadd.f32 %v993_v60, %v992_v59  ;;  %1594 = vmatpush3.bf16.msra.mxu1 %v1808_v11  ;;  %v1820_v59 = vld [vmem:[#allocation8 + $0xd8] sm:$0xff]   ;;  %v1821_v60 = vld [vmem:[#allocation8 + $0xe0] sm:$0xff]   ;;  %v1504_v11 = vld [vmem:[%s2135_s5 + $0x2] ss:$0 sm:$0xff] }
 0x341   :  { %1619 = vmatprep.subr.bf16.mxu1 %v1931_v0 }
 0x342   :  { %v995_v62 = vmul.f32 0.0625, %v994_v61  ;;  %v1822_v61 = vld [vmem:[#allocation8 + $0xe8] sm:$0xff]  }
 0x344   :  { %v996_v63 = vadd.f32 1e-05, %v995_v62  ;;  %v1494_v62 = vld [vmem:[%s2135_s5 + $0x1] ss:$0 sm:$0xff] }
 0x346   :  { %1825 = vrsqrt.f32 %v996_v63 }
 0x350   :  { %v1826_v1 = vpop.eup %1825 }
 0x351   :  { %v2078_v2 = vmul.f32 %v1826_v1, %v984_v51  ;;  %v2080_v3 = vmul.f32 %v1826_v1, %v985_v52 }
 0x3f6   :  { %v966_v19 = vpop.f32.mrb[4].mxu1 }
 0x3f7   :  { %v967_v20 = vadd.f32 %v1484_v18, %v966_v19  ;;  %v1577_v21 = vpop.f32.mrb[5].mxu1 }
 0x3f8   :  { %v969_v22 = vpop.f32.mrb[6].mxu1 }
 0x3f9   :  { %v970_v23 = vadd.f32 %v1484_v18, %v969_v22  ;;  %v1578_v24 = vpop.f32.mrb[7].mxu1  ;;  %v973_v25 = vmax.f32 %v967_v20, 0.0 }
 0x3fb   :  { %v974_v26 = vmax.f32 %v970_v23, 0.0 }
 0x3fd   :  { %v1000_v27 = vadd.f32 %v974_v26, %v973_v25 }
 0x3ff   :  { %v1001_v28 = vrot.slane %v1000_v27, 4 }
 0x401   :  { %v1002_v29 = vadd.f32 %v1001_v28, %v1000_v27 }
 0x403   :  { %v1003_v30 = vrot.slane %v1002_v29, 2 }
 0x405   :  { %v1004_v31 = vadd.f32 %v1003_v30, %v1002_v29 }
 0x407   :  { %v1005_v32 = vrot.slane %v1004_v31, 1 }
 0x409   :  { %v1006_v33 = vadd.f32 %v1005_v32, %v1004_v31 }
 0x40b   :  { %v1007_v34 = vmul.f32 0.0625, %v1006_v33 }
 0x40d   :  { %v1008_v35 = vsub.f32 %v973_v25, %v1007_v34  ;;  %v1009_v36 = vsub.f32 %v974_v26, %v1007_v34 }
 0x40f   :  { %v1010_v37 = vmul.f32 %v1008_v35, %v1008_v35  ;;  %v1011_v38 = vmul.f32 %v1009_v36, %v1009_v36 }
 0x411   :  { %v1012_v39 = vadd.f32 %v1011_v38, %v1010_v37 }
 0x413   :  { %v1013_v40 = vrot.slane %v1012_v39, 4 }
 0x415   :  { %v1014_v41 = vadd.f32 %v1013_v40, %v1012_v39 }
 0x417   :  { %v1015_v43 = vrot.slane %v1014_v41, 2 }
 0x419   :  { %v1016_v45 = vadd.f32 %v1015_v43, %v1014_v41 }
 0x41b   :  { %v1017_v46 = vrot.slane %v1016_v45, 1 }
 0x41d   :  { %v1018_v47 = vadd.f32 %v1017_v46, %v1016_v45 }
 0x41f   :  { %v1019_v42 = vmul.f32 0.0625, %v1018_v47 }
 0x421   :  { %v1020_v44 = vadd.f32 1e-05, %v1019_v42 }
 0x423   :  { %1827 = vrsqrt.f32 %v1020_v44 }
 0x42d   :  { %v1828_v48 = vpop.eup %1827 }
 0x42e   :  { %v1022_v49 = vmul.f32 %v1828_v48, %v1008_v35  ;;  %v1023_v50 = vmul.f32 %v1828_v48, %v1009_v36 }
 0x430   :  { %v2100_v51 = vadd.f32 %v1023_v50, %v2080_v3  ;;  %v1024_v52 = vadd.f32 %v1022_v49, %v2078_v2 }
 0x432   :  { %v1026_v53 = vpack.c.bf16 %v2100_v51, %v1024_v52 }
 0x434   :  { %1596 = vmatmul.mubr.bf16.vlgmr.msra.gmra.mrb[8].mxu1 %v1026_v53 }
 0x435   :  { %1635 = vmatprep.mubr.msk.bf16.mxu1 %vm1932_vm2, %v1931_v0  ;;  %1620 = vmatpush3.bf16.msra.mxu1 %v1817_v56 }
 0x436   :  { %1621 = vmatprep.subr.bf16.mxu1 %v1931_v0 }
 0x439   :  { %1622 = vmatpush3.bf16.msra.mxu1 %v1818_v57 }
 0x43a   :  { %1623 = vmatprep.subr.bf16.mxu1 %v1931_v0 }
 0x43d   :  { %1624 = vmatpush3.bf16.msra.mxu1 %v1819_v58 }
 0x43e   :  { %1625 = vmatprep.subr.bf16.mxu1 %v1931_v0 }
 0x441   :  { %1626 = vmatpush3.bf16.msra.mxu1 %v1820_v59 }
 0x442   :  { %1627 = vmatprep.subr.bf16.mxu1 %v1931_v0 }
 0x445   :  { %1628 = vmatpush3.bf16.msra.mxu1 %v1821_v60 }
 0x446   :  { %1629 = vmatprep.subr.bf16.mxu1 %v1931_v0 }
 0x449   :  { %1630 = vmatpush3.bf16.msra.mxu1 %v1822_v61 }
 0x44a   :  { %1631 = vmatprep.subr.bf16.mxu1 %v1931_v0 }
 0x44d   :  { %1632 = vmatpush3.bf16.msra.mxu1 %v1823_v9 }
 0x44e   :  { %1633 = vmatprep.subr.bf16.mxu1 %v1931_v0  ;;  %v1514_v0 = vld [vmem:[%s2135_s5 + $0x3] ss:$0 sm:$0xff] }
 0x451   :  { %1634 = vmatpush3.bf16.msra.mxu1 %v1824_v10 }
 0x507   :  { %v1134_v63 = vpop.f32.mrb[8].mxu1 }
 0x508   :  { %v1135_v1 = vadd.f32 %v1494_v62, %v1134_v63  ;;  %v1597_v2 = vpop.f32.mrb[9].mxu1 }
 0x509   :  { %v1137_v3 = vpop.f32.mrb[10].mxu1 }
 0x50a   :  { %v1138_v4 = vadd.f32 %v1494_v62, %v1137_v3  ;;  %v1598_v5 = vpop.f32.mrb[11].mxu1  ;;  %v1141_v6 = vmax.f32 %v1135_v1, 0.0 }
 0x50c   :  { %v1142_v7 = vmax.f32 %v1138_v4, 0.0 }
 0x50e   :  { %v1143_v8 = vpack.c.bf16 %v1142_v7, %v1141_v6 }
 0x510   :  { %1616 = vmatmul.mubr.bf16.vlgmr.msra.gmra.mrb[8].mxu0 %v1143_v8 }
 0x5e3   :  { %v1251_v12 = vpop.f32.mrb[8].mxu0 }
 0x5e4   :  { %v1252_v13 = vadd.f32 %v1504_v11, %v1251_v12  ;;  %v1617_v14 = vpop.f32.mrb[9].mxu0 }
 0x5e5   :  { %v1254_v15 = vpop.f32.mrb[10].mxu0 }
 0x5e6   :  { %v1255_v16 = vadd.f32 %v1504_v11, %v1254_v15  ;;  %v1618_v17 = vpop.f32.mrb[11].mxu0  ;;  %v1258_v18 = vmax.f32 %v1252_v13, 0.0 }
 0x5e8   :  { %v1259_v19 = vmax.f32 %v1255_v16, 0.0 }
 0x5ea   :  { %v1260_v20 = vpack.c.bf16 %v1259_v19, %v1258_v18 }
 0x5ec   :  { %1636 = vmatmul.mubr.bf16.vlgmr.msra.gmra.mrb[12].mxu1 %v1260_v20 }
 0x6bf   :  { %v1368_v21 = vpop.f32.mrb[12].mxu1 }
 0x6c0   :  { %v1369_v22 = vadd.f32 %v1514_v0, %v1368_v21  ;;  %v1637_v23 = vpop.f32.mrb[13].mxu1 }
 0x6c1   :  { %v1371_v24 = vpop.f32.mrb[14].mxu1 }
 0x6c2   :  { %v1375_v25 = vadd.f32 %v1369_v22, %v1024_v52  ;;  %v1372_v26 = vadd.f32 %v1514_v0, %v1371_v24  ;;  %v1638_v27 = vpop.f32.mrb[15].mxu1 }
 0x6c4   :  { %1377 = vst [vmem:[%s2136_s6] sm:$0xff] %v1375_v25  ;;  %v1376_v28 = vadd.f32 %v1372_v26, %v2100_v51 }
 0x6c6   :  { %1378 = vst [vmem:[%s2136_s6 + $0x8] sm:$0xff] %v1376_v28 }
 0x6c7   :  { %1383 = vsyncpa [#allocation4], 1 }
 0x6c8   :  { %1384 = vsyncpa [#allocation6], 1 }
 0x6c9   :  { %1385 = vsyncpa [#allocation9], 1 }

</bundles_post_ra>
